<compile_context>
chip_gen: v6e
topology: v6e:2x2x1
jax: 0.10.0
libtpu: 0.0.40
codegen_flags: <defaults>
</compile_context>

<pallas_src>
import functools

import jax
import jax.numpy as jnp
from jax.experimental import pallas as pl
from jax.experimental.pallas import tpu as pltpu


def dnn_kernel(x_ref, m2_ref, m3_ref, m4_ref,
               w1_ref, b1_ref, w2_ref, b2_ref, w3_ref, b3_ref,
               w4_ref, b4_ref, w5_ref, b5_ref,
               out_ref, *, approx_recip):
    # fc1 -> sigmoid (bf16 MXU inputs, f32 accumulation)
    x = x_ref[...].astype(jnp.bfloat16)
    h = jnp.dot(x, w1_ref[...], preferred_element_type=jnp.float32) + b1_ref[...]
    h = jax.nn.sigmoid(h)

    def hidden_layer(h, w_ref, b_ref, m_ref):
        z = jnp.dot(h.astype(jnp.bfloat16), w_ref[...],
                    preferred_element_type=jnp.float32) + b_ref[...]
        # m_ref holds the pre-scaled dropout mask (values in {0, 1/(1-p)}),
        # applied to the pre-activation exactly like sigmoid(F.dropout(fc(x))).
        return jax.nn.sigmoid(z * m_ref[...])

    h = hidden_layer(h, w2_ref, b2_ref, m2_ref)
    h = hidden_layer(h, w3_ref, b3_ref, m3_ref)
    h = hidden_layer(h, w4_ref, b4_ref, m4_ref)

    # fc_out -> softmax over the last dim (torch's implicit dim=1 for 2-D x)
    logits = jnp.dot(h.astype(jnp.bfloat16), w5_ref[...],
                     preferred_element_type=jnp.float32) + b5_ref[...]
    m = jnp.max(logits, axis=-1, keepdims=True)
    e = jnp.exp(logits - m)
    denom = jnp.sum(e, axis=-1, keepdims=True)
    if approx_recip:
        inv = pl.reciprocal(denom, approx=True)   # EUP vrcp, ~free on TPU
    else:
        inv = 1.0 / denom                          # portable fallback
    out_ref[...] = (e * inv).astype(out_ref.dtype)


def dnn_forward(x, params, dropout_key, *, block_b=512, dropout_p=0.5):
    """x: [B, nin] float32. params: dict of bf16 w / f32 b. dropout_key: PRNGKey."""
    B, nin = x.shape
    nhid = params["w1"].shape[1]
    nout = params["w5"].shape[1]

    # --- training-mode dropout masks (pre-scaled by 1/(1-p)) ---
    k2, k3, k4 = jax.random.split(dropout_key, 3)
    scale = 1.0 / (1.0 - dropout_p)

    def make_mask(k):
        keep = jax.random.bernoulli(k, 1.0 - dropout_p, (B, nhid))
        return keep.astype(jnp.float32) * scale

    m2, m3, m4 = make_mask(k2), make_mask(k3), make_mask(k4)

    # --- batch tiling: sublane-friendly tile, pad B if needed ---
    tb = min(block_b, max(8, -(-B // 8) * 8))
    tb = max(8, (tb // 8) * 8)
    b_pad = -(-B // tb) * tb
    if b_pad != B:
        pad = b_pad - B
        x = jnp.pad(x, ((0, pad), (0, 0)))
        m2 = jnp.pad(m2, ((0, pad), (0, 0)))
        m3 = jnp.pad(m3, ((0, pad), (0, 0)))
        m4 = jnp.pad(m4, ((0, pad), (0, 0)))
    grid = (b_pad // tb,)

    def tile_rows(cols):
        return pl.BlockSpec((tb, cols), lambda i: (i, 0))

    def resident(shape):
        return pl.BlockSpec(shape, lambda i: (0, 0))

    in_specs = [
        tile_rows(nin),           # x
        tile_rows(nhid),          # dropout mask 2
        tile_rows(nhid),          # dropout mask 3
        tile_rows(nhid),          # dropout mask 4
        resident((nin, nhid)),    # w1
        resident((1, nhid)),      # b1
        resident((nhid, nhid)),   # w2
        resident((1, nhid)),      # b2
        resident((nhid, nhid)),   # w3
        resident((1, nhid)),      # b3
        resident((nhid, nhid)),   # w4
        resident((1, nhid)),      # b4
        resident((nhid, nout)),   # w5
        resident((1, nout)),      # b5
    ]
    out_specs = tile_rows(nout)

    flops = 2 * b_pad * (nin * nhid + 3 * nhid * nhid + nhid * nout)
    transcendentals = b_pad * (4 * nhid + nout)
    weight_bytes = sum(int(params[k].size) * params[k].dtype.itemsize for k in params)
    bytes_accessed = (weight_bytes + int(x.size) * 4
                      + 3 * b_pad * nhid * 4 + b_pad * nout * 4)

    approx_recip = jax.default_backend() == "tpu"

    out = pl.pallas_call(
        functools.partial(dnn_kernel, approx_recip=approx_recip),
        out_shape=jax.ShapeDtypeStruct((b_pad, nout), jnp.float32),
        grid=grid,
        in_specs=in_specs,
        out_specs=out_specs,
        compiler_params=pltpu.CompilerParams(
            dimension_semantics=("parallel",),
            vmem_limit_bytes=32 * 1024 * 1024,
        ),
        cost_estimate=pl.CostEstimate(
            flops=int(flops),
            transcendentals=int(transcendentals),
            bytes_accessed=int(bytes_accessed),
        ),
    )(x, m2, m3, m4,
      params["w1"], params["b1"], params["w2"], params["b2"],
      params["w3"], params["b3"], params["w4"], params["b4"],
      params["w5"], params["b5"])

    return out[:B]


def init_params(key, nin, nhid, nout):
    """Xavier-normal weights (bf16, [in,out] layout), zero biases — matches init_linear."""
    dims = [(nin, nhid), (nhid, nhid), (nhid, nhid), (nhid, nhid), (nhid, nout)]
    params = {}
    for i, (fan_in, fan_out) in enumerate(dims, start=1):
        key, sub = jax.random.split(key)
        std = (2.0 / (fan_in + fan_out)) ** 0.5
        w = std * jax.random.normal(sub, (fan_in, fan_out), jnp.float32)
        params[f"w{i}"] = w.astype(jnp.bfloat16)     # MXU-native input dtype
        params[f"b{i}"] = jnp.zeros((1, fan_out), jnp.float32)
    return params


if __name__ == "__main__":
    # Lane-dense hidden width (multiple of 128); small batch exercises a
    # 2-step parallel grid with block_b=8.
    nin, nhid, nout = 32, 128, 16
    batch = 16

    key = jax.random.PRNGKey(0)
    key, xkey, dkey = jax.random.split(key, 3)
    x = jax.random.normal(xkey, (batch, nin), jnp.float32)
    params = init_params(key, nin, nhid, nout)

    out = dnn_forward(x, params, dkey, block_b=8)
    out = jax.block_until_ready(out)

    assert out.shape == (batch, nout)
    assert bool(jnp.all(jnp.isfinite(out)))
    # softmax rows sum to ~1 (looser tol: bf16 matmuls + approx reciprocal)
    assert bool(jnp.allclose(jnp.sum(out, axis=-1), 1.0, atol=1e-2))

    print("KERNEL_OK")
</pallas_src>

<mosaic_0001>
module attributes {stable_mosaic.version = 11 : i64} {
  func.func @dnn_kernel(%arg0: i32, %arg1: memref<8x32xf32, #tpu.memory_space<vmem>>, %arg2: memref<8x128xf32, #tpu.memory_space<vmem>>, %arg3: memref<8x128xf32, #tpu.memory_space<vmem>>, %arg4: memref<8x128xf32, #tpu.memory_space<vmem>>, %arg5: memref<32x128xbf16, #tpu.memory_space<vmem>>, %arg6: memref<1x128xf32, #tpu.memory_space<vmem>>, %arg7: memref<128x128xbf16, #tpu.memory_space<vmem>>, %arg8: memref<1x128xf32, #tpu.memory_space<vmem>>, %arg9: memref<128x128xbf16, #tpu.memory_space<vmem>>, %arg10: memref<1x128xf32, #tpu.memory_space<vmem>>, %arg11: memref<128x128xbf16, #tpu.memory_space<vmem>>, %arg12: memref<1x128xf32, #tpu.memory_space<vmem>>, %arg13: memref<128x16xbf16, #tpu.memory_space<vmem>>, %arg14: memref<1x16xf32, #tpu.memory_space<vmem>>, %arg15: memref<8x16xf32, #tpu.memory_space<vmem>>) attributes {dimension_semantics = [#tpu.dimension_semantics<parallel>], iteration_bounds = array<i64: 2>, scalar_prefetch = 0 : i64, scratch_operands = 0 : i64, tpu.core_type = #tpu.core_type<tc>, window_params = [{transform_indices = @transform_0, window_bounds = array<i64: 8, 32>}, {transform_indices = @transform_1, window_bounds = array<i64: 8, 128>}, {transform_indices = @transform_2, window_bounds = array<i64: 8, 128>}, {transform_indices = @transform_3, window_bounds = array<i64: 8, 128>}, {pipeline_mode = #tpu.pipeline_mode<synchronous>, transform_indices = @transform_4, window_bounds = array<i64: 32, 128>}, {pipeline_mode = #tpu.pipeline_mode<synchronous>, transform_indices = @transform_5, window_bounds = array<i64: 1, 128>}, {pipeline_mode = #tpu.pipeline_mode<synchronous>, transform_indices = @transform_6, window_bounds = array<i64: 128, 128>}, {pipeline_mode = #tpu.pipeline_mode<synchronous>, transform_indices = @transform_7, window_bounds = array<i64: 1, 128>}, {pipeline_mode = #tpu.pipeline_mode<synchronous>, transform_indices = @transform_8, window_bounds = array<i64: 128, 128>}, {pipeline_mode = #tpu.pipeline_mode<synchronous>, transform_indices = @transform_9, window_bounds = array<i64: 1, 128>}, {pipeline_mode = #tpu.pipeline_mode<synchronous>, transform_indices = @transform_10, window_bounds = array<i64: 128, 128>}, {pipeline_mode = #tpu.pipeline_mode<synchronous>, transform_indices = @transform_11, window_bounds = array<i64: 1, 128>}, {pipeline_mode = #tpu.pipeline_mode<synchronous>, transform_indices = @transform_12, window_bounds = array<i64: 128, 16>}, {pipeline_mode = #tpu.pipeline_mode<synchronous>, transform_indices = @transform_13, window_bounds = array<i64: 1, 16>}, {transform_indices = @transform_14, window_bounds = array<i64: 8, 16>}]} {
    %c0 = arith.constant 0 : index
    %c0_0 = arith.constant 0 : index
    %0 = vector.load %arg1[%c0, %c0_0] : memref<8x32xf32, #tpu.memory_space<vmem>>, vector<8x32xf32>
    %1 = arith.truncf %0 : vector<8x32xf32> to vector<8x32xbf16>
    %c0_1 = arith.constant 0 : index
    %c0_2 = arith.constant 0 : index
    %2 = vector.load %arg5[%c0_1, %c0_2] : memref<32x128xbf16, #tpu.memory_space<vmem>>, vector<32x128xbf16>
    %cst = arith.constant dense<0.000000e+00> : vector<8x128xf32>
    %3 = tpu.matmul %1, %2, %cst {dimension_numbers = #tpu.dot_dimension_numbers<[1], [0], [0], [1], [0, 0, 1, 1], [], []>} : vector<8x32xbf16>, vector<32x128xbf16>, vector<8x128xf32> -> vector<8x128xf32>
    %c0_3 = arith.constant 0 : index
    %c0_4 = arith.constant 0 : index
    %4 = vector.load %arg6[%c0_3, %c0_4] : memref<1x128xf32, #tpu.memory_space<vmem>>, vector<1x128xf32>
    %5 = vector.broadcast %4 : vector<1x128xf32> to vector<8x128xf32>
    %6 = arith.addf %3, %5 : vector<8x128xf32>
    %7 = arith.negf %6 : vector<8x128xf32>
    %8 = math.exp %7 : vector<8x128xf32>
    %cst_5 = arith.constant 1.000000e+00 : f32
    %9 = vector.broadcast %cst_5 : f32 to vector<8x128xf32>
    %10 = arith.addf %9, %8 : vector<8x128xf32>
    %11 = arith.divf %9, %10 : vector<8x128xf32>
    %12 = arith.truncf %11 : vector<8x128xf32> to vector<8x128xbf16>
    %c0_6 = arith.constant 0 : index
    %c0_7 = arith.constant 0 : index
    %13 = vector.load %arg7[%c0_6, %c0_7] : memref<128x128xbf16, #tpu.memory_space<vmem>>, vector<128x128xbf16>
    %cst_8 = arith.constant dense<0.000000e+00> : vector<8x128xf32>
    %14 = tpu.matmul %12, %13, %cst_8 {dimension_numbers = #tpu.dot_dimension_numbers<[1], [0], [0], [1], [0, 0, 1, 1], [], []>} : vector<8x128xbf16>, vector<128x128xbf16>, vector<8x128xf32> -> vector<8x128xf32>
    %c0_9 = arith.constant 0 : index
    %c0_10 = arith.constant 0 : index
    %15 = vector.load %arg8[%c0_9, %c0_10] : memref<1x128xf32, #tpu.memory_space<vmem>>, vector<1x128xf32>
    %16 = vector.broadcast %15 : vector<1x128xf32> to vector<8x128xf32>
    %17 = arith.addf %14, %16 : vector<8x128xf32>
    %c0_11 = arith.constant 0 : index
    %c0_12 = arith.constant 0 : index
    %18 = vector.load %arg2[%c0_11, %c0_12] : memref<8x128xf32, #tpu.memory_space<vmem>>, vector<8x128xf32>
    %19 = arith.mulf %17, %18 : vector<8x128xf32>
    %20 = arith.negf %19 : vector<8x128xf32>
    %21 = math.exp %20 : vector<8x128xf32>
    %cst_13 = arith.constant 1.000000e+00 : f32
    %22 = vector.broadcast %cst_13 : f32 to vector<8x128xf32>
    %23 = arith.addf %22, %21 : vector<8x128xf32>
    %24 = arith.divf %22, %23 : vector<8x128xf32>
    %25 = arith.truncf %24 : vector<8x128xf32> to vector<8x128xbf16>
    %c0_14 = arith.constant 0 : index
    %c0_15 = arith.constant 0 : index
    %26 = vector.load %arg9[%c0_14, %c0_15] : memref<128x128xbf16, #tpu.memory_space<vmem>>, vector<128x128xbf16>
    %cst_16 = arith.constant dense<0.000000e+00> : vector<8x128xf32>
    %27 = tpu.matmul %25, %26, %cst_16 {dimension_numbers = #tpu.dot_dimension_numbers<[1], [0], [0], [1], [0, 0, 1, 1], [], []>} : vector<8x128xbf16>, vector<128x128xbf16>, vector<8x128xf32> -> vector<8x128xf32>
    %c0_17 = arith.constant 0 : index
    %c0_18 = arith.constant 0 : index
    %28 = vector.load %arg10[%c0_17, %c0_18] : memref<1x128xf32, #tpu.memory_space<vmem>>, vector<1x128xf32>
    %29 = vector.broadcast %28 : vector<1x128xf32> to vector<8x128xf32>
    %30 = arith.addf %27, %29 : vector<8x128xf32>
    %c0_19 = arith.constant 0 : index
    %c0_20 = arith.constant 0 : index
    %31 = vector.load %arg3[%c0_19, %c0_20] : memref<8x128xf32, #tpu.memory_space<vmem>>, vector<8x128xf32>
    %32 = arith.mulf %30, %31 : vector<8x128xf32>
    %33 = arith.negf %32 : vector<8x128xf32>
    %34 = math.exp %33 : vector<8x128xf32>
    %cst_21 = arith.constant 1.000000e+00 : f32
    %35 = vector.broadcast %cst_21 : f32 to vector<8x128xf32>
    %36 = arith.addf %35, %34 : vector<8x128xf32>
    %37 = arith.divf %35, %36 : vector<8x128xf32>
    %38 = arith.truncf %37 : vector<8x128xf32> to vector<8x128xbf16>
    %c0_22 = arith.constant 0 : index
    %c0_23 = arith.constant 0 : index
    %39 = vector.load %arg11[%c0_22, %c0_23] : memref<128x128xbf16, #tpu.memory_space<vmem>>, vector<128x128xbf16>
    %cst_24 = arith.constant dense<0.000000e+00> : vector<8x128xf32>
    %40 = tpu.matmul %38, %39, %cst_24 {dimension_numbers = #tpu.dot_dimension_numbers<[1], [0], [0], [1], [0, 0, 1, 1], [], []>} : vector<8x128xbf16>, vector<128x128xbf16>, vector<8x128xf32> -> vector<8x128xf32>
    %c0_25 = arith.constant 0 : index
    %c0_26 = arith.constant 0 : index
    %41 = vector.load %arg12[%c0_25, %c0_26] : memref<1x128xf32, #tpu.memory_space<vmem>>, vector<1x128xf32>
    %42 = vector.broadcast %41 : vector<1x128xf32> to vector<8x128xf32>
    %43 = arith.addf %40, %42 : vector<8x128xf32>
    %c0_27 = arith.constant 0 : index
    %c0_28 = arith.constant 0 : index
    %44 = vector.load %arg4[%c0_27, %c0_28] : memref<8x128xf32, #tpu.memory_space<vmem>>, vector<8x128xf32>
    %45 = arith.mulf %43, %44 : vector<8x128xf32>
    %46 = arith.negf %45 : vector<8x128xf32>
    %47 = math.exp %46 : vector<8x128xf32>
    %cst_29 = arith.constant 1.000000e+00 : f32
    %48 = vector.broadcast %cst_29 : f32 to vector<8x128xf32>
    %49 = arith.addf %48, %47 : vector<8x128xf32>
    %50 = arith.divf %48, %49 : vector<8x128xf32>
    %51 = arith.truncf %50 : vector<8x128xf32> to vector<8x128xbf16>
    %c0_30 = arith.constant 0 : index
    %c0_31 = arith.constant 0 : index
    %52 = vector.load %arg13[%c0_30, %c0_31] : memref<128x16xbf16, #tpu.memory_space<vmem>>, vector<128x16xbf16>
    %cst_32 = arith.constant dense<0.000000e+00> : vector<8x16xf32>
    %53 = tpu.matmul %51, %52, %cst_32 {dimension_numbers = #tpu.dot_dimension_numbers<[1], [0], [0], [1], [0, 0, 1, 1], [], []>} : vector<8x128xbf16>, vector<128x16xbf16>, vector<8x16xf32> -> vector<8x16xf32>
    %c0_33 = arith.constant 0 : index
    %c0_34 = arith.constant 0 : index
    %54 = vector.load %arg14[%c0_33, %c0_34] : memref<1x16xf32, #tpu.memory_space<vmem>>, vector<1x16xf32>
    %55 = vector.broadcast %54 : vector<1x16xf32> to vector<8x16xf32>
    %56 = arith.addf %53, %55 : vector<8x16xf32>
    %cst_35 = arith.constant dense<0xFF800000> : vector<8xf32>
    %57 = vector.multi_reduction <maximumf>, %56, %cst_35 [1] : vector<8x16xf32> to vector<8xf32>
    %58 = vector.shape_cast %57 : vector<8xf32> to vector<8x1xf32>
    %59 = vector.broadcast %58 : vector<8x1xf32> to vector<8x16xf32>
    %60 = arith.subf %56, %59 : vector<8x16xf32>
    %61 = math.exp %60 : vector<8x16xf32>
    %cst_36 = arith.constant dense<0.000000e+00> : vector<8xf32>
    %62 = vector.multi_reduction <add>, %61, %cst_36 [1] : vector<8x16xf32> to vector<8xf32>
    %63 = vector.shape_cast %62 : vector<8xf32> to vector<8x1xf32>
    %cst_37 = arith.constant 1.000000e+00 : f32
    %64 = vector.broadcast %cst_37 : f32 to vector<8x1xf32>
    %65 = arith.divf %64, %63 : vector<8x1xf32>
    %66 = vector.broadcast %65 : vector<8x1xf32> to vector<8x16xf32>
    %67 = arith.mulf %61, %66 : vector<8x16xf32>
    %c0_38 = arith.constant 0 : index
    %c0_39 = arith.constant 0 : index
    %68 = vector.load %arg15[%c0_38, %c0_39] : memref<8x16xf32, #tpu.memory_space<vmem>>, vector<8x16xf32>
    tpu.vector_store %arg15[%c0_38, %c0_39], %67 {strides = array<i32>} : memref<8x16xf32, #tpu.memory_space<vmem>>, vector<8x16xf32>,
    return
  }
  func.func @transform_0(%arg0: i32) -> (i32, i32) {
    %c0_i32 = arith.constant 0 : i32
    %c0_i32_0 = arith.constant 0 : i32
    return %arg0, %c0_i32 : i32, i32
  }
  func.func @transform_1(%arg0: i32) -> (i32, i32) {
    %c0_i32 = arith.constant 0 : i32
    %c0_i32_0 = arith.constant 0 : i32
    return %arg0, %c0_i32 : i32, i32
  }
  func.func @transform_2(%arg0: i32) -> (i32, i32) {
    %c0_i32 = arith.constant 0 : i32
    %c0_i32_0 = arith.constant 0 : i32
    return %arg0, %c0_i32 : i32, i32
  }
  func.func @transform_3(%arg0: i32) -> (i32, i32) {
    %c0_i32 = arith.constant 0 : i32
    %c0_i32_0 = arith.constant 0 : i32
    return %arg0, %c0_i32 : i32, i32
  }
  func.func @transform_4(%arg0: i32) -> (i32, i32) {
    %c0_i32 = arith.constant 0 : i32
    %c0_i32_0 = arith.constant 0 : i32
    %c0_i32_1 = arith.constant 0 : i32
    return %c0_i32, %c0_i32_0 : i32, i32
  }
  func.func @transform_5(%arg0: i32) -> (i32, i32) {
    %c0_i32 = arith.constant 0 : i32
    %c0_i32_0 = arith.constant 0 : i32
    %c0_i32_1 = arith.constant 0 : i32
    return %c0_i32, %c0_i32_0 : i32, i32
  }
  func.func @transform_6(%arg0: i32) -> (i32, i32) {
    %c0_i32 = arith.constant 0 : i32
    %c0_i32_0 = arith.constant 0 : i32
    %c0_i32_1 = arith.constant 0 : i32
    return %c0_i32, %c0_i32_0 : i32, i32
  }
  func.func @transform_7(%arg0: i32) -> (i32, i32) {
    %c0_i32 = arith.constant 0 : i32
    %c0_i32_0 = arith.constant 0 : i32
    %c0_i32_1 = arith.constant 0 : i32
    return %c0_i32, %c0_i32_0 : i32, i32
  }
  func.func @transform_8(%arg0: i32) -> (i32, i32) {
    %c0_i32 = arith.constant 0 : i32
    %c0_i32_0 = arith.constant 0 : i32
    %c0_i32_1 = arith.constant 0 : i32
    return %c0_i32, %c0_i32_0 : i32, i32
  }
  func.func @transform_9(%arg0: i32) -> (i32, i32) {
    %c0_i32 = arith.constant 0 : i32
    %c0_i32_0 = arith.constant 0 : i32
    %c0_i32_1 = arith.constant 0 : i32
    return %c0_i32, %c0_i32_0 : i32, i32
  }
  func.func @transform_10(%arg0: i32) -> (i32, i32) {
    %c0_i32 = arith.constant 0 : i32
    %c0_i32_0 = arith.constant 0 : i32
    %c0_i32_1 = arith.constant 0 : i32
    return %c0_i32, %c0_i32_0 : i32, i32
  }
  func.func @transform_11(%arg0: i32) -> (i32, i32) {
    %c0_i32 = arith.constant 0 : i32
    %c0_i32_0 = arith.constant 0 : i32
    %c0_i32_1 = arith.constant 0 : i32
    return %c0_i32, %c0_i32_0 : i32, i32
  }
  func.func @transform_12(%arg0: i32) -> (i32, i32) {
    %c0_i32 = arith.constant 0 : i32
    %c0_i32_0 = arith.constant 0 : i32
    %c0_i32_1 = arith.constant 0 : i32
    return %c0_i32, %c0_i32_0 : i32, i32
  }
  func.func @transform_13(%arg0: i32) -> (i32, i32) {
    %c0_i32 = arith.constant 0 : i32
    %c0_i32_0 = arith.constant 0 : i32
    %c0_i32_1 = arith.constant 0 : i32
    return %c0_i32, %c0_i32_0 : i32, i32
  }
  func.func @transform_14(%arg0: i32) -> (i32, i32) {
    %c0_i32 = arith.constant 0 : i32
    %c0_i32_0 = arith.constant 0 : i32
    return %arg0, %c0_i32 : i32, i32
  }
}

</mosaic_0001>

<bundles_post_ra>
// kernel: tpu_custom_call.1
= control target key start
LH: loop header
LB: loop body
LE: loop exit
PB: predicated region body
PF: predicated region fallthrough
CT: control target
= control target key end

     0   :  { %s2602_s0 = inlined_call_operand.vmem [shape: f32[16,32], index: 0, kind: input, shape index: {}]   ;;  %s2603_s1 = inlined_call_operand.hbm [shape: f32[16,128], index: 1, kind: input, shape index: {}]   ;;  %s2604_s2 = inlined_call_operand.hbm [shape: f32[16,128], index: 2, kind: input, shape index: {}]   ;;  %s2605_s3 = inlined_call_operand.hbm [shape: f32[16,128], index: 3, kind: input, shape index: {}]   ;;  %s2606_s4 = inlined_call_operand.hbm [shape: bf16[32,128], index: 4, kind: input, shape index: {}]   ;;  %s2607_s5 = inlined_call_operand.hbm [shape: f32[1,128], index: 5, kind: input, shape index: {}]   ;;  %s2608_s6 = inlined_call_operand.vmem [shape: bf16[128,128], index: 6, kind: input, shape index: {}]   ;;  %s2609_s7 = inlined_call_operand.hbm [shape: f32[1,128], index: 7, kind: input, shape index: {}]   ;;  %s2610_s8 = inlined_call_operand.hbm [shape: bf16[128,128], index: 8, kind: input, shape index: {}]   ;;  %s2611_s9 = inlined_call_operand.hbm [shape: f32[1,128], index: 9, kind: input, shape index: {}]   ;;  %s2612_s10 = inlined_call_operand.hbm [shape: bf16[128,128], index: 10, kind: input, shape index: {}]   ;;  %s2613_s11 = inlined_call_operand.vmem [shape: f32[1,128], index: 11, kind: input, shape index: {}]   ;;  %s2614_s12 = inlined_call_operand.vmem [shape: bf16[128,16], index: 12, kind: input, shape index: {}]   ;;  %s2615_s13 = inlined_call_operand.vmem [shape: f32[1,16], index: 13, kind: input, shape index: {}]   ;;  %s2616_s14 = inlined_call_operand.hbm [shape: f32[16,16], index: 14, kind: output, shape index: {}]  }
   0x1   :  { %2644 = sst [smem:[#allocation30_spill]] %s2606_s4 }
   0x2   :  { %2645 = sst [smem:[#allocation31_spill]] %s2608_s6 }
   0x3   :  { %2646 = sst [smem:[#allocation32_spill]] %s2609_s7 }
   0x4   :  { %2647 = sst [smem:[#allocation33_spill]] %s2611_s9 }
   0x5   :  { %2648 = sst [smem:[#allocation34_spill]] %s2613_s11 }
   0x6   :  { %2649 = sst [smem:[#allocation35_spill]] %s2614_s12 }
   0x7   :  { %2650 = sst [smem:[#allocation36_spill]] %s2615_s13 }
   0x8   :  { %2651 = sst [smem:[#allocation37_spill]] %s2616_s14 }
   0x9   :  { %19 = vsyncpa [#allocation3], 0 }
   0xa   :  { %21 = vsyncpa [#allocation3 + $0x1], 0 }
   0xb   :  { %22 = vsyncpa [#allocation6], 0 }
   0xc   :  { %24 = vsyncpa [#allocation6 + $0x1], 0 }
   0xd   :  { %25 = vsyncpa [#allocation9], 0 }
   0xe   :  { %26 = vsyncpa [#allocation12], 0 }
   0xf   :  { %27 = vsyncpa [#allocation15], 0 }
  0x10   :  { %28 = vsyncpa [#allocation4], 0 }
  0x11   :  { %30 = vsyncpa [#allocation4 + $0x1], 0  ;;  %s2198_s29 = smov 0   ;;  %s2200_s30 = smov 0  }
  0x12   :  { %s2202_s15 = smov 0   ;;  %s2204_s16 = smov 0  }
  0x13 LB: > { %2652 = sst [smem:[#allocation24_spill]] %s2095_s29  ;;  %s2109_s17 = smov [#allocation8]   ;;  %s2107_s16 = sphi %s2204_s16, %s2696_s16   ;;  %s2103_s15 = sphi %s2202_s15, %s2700_s15   ;;  %s2099_s30 = sphi %s2200_s30, %s2699_s30   ;;  %s2095_s29 = sphi %s2198_s29, %s2698_s29  }
  0x14   : > { %2653 = sst [smem:[#allocation25_spill]] %s2107_s16  ;;  %s393_s18 = sshll.u32 %s2109_s17, 4  ;;  %s394_s18 = int_to_ptr.vmem [resolvable:$true] %s393_s18 }
  0x15   : > { %s2219_s19 = sadd.s32 4294967295, %s2107_s16   ;;  %p1411_p0 = scmp.ge.s32.totalorder %s2107_s16, 1 }
  0x16   : > { %p2629_p1 = scmp.eq.s32.totalorder %s2219_s19, 0  ;;  %p381_p2 = scmp.lt.s32.totalorder %s2107_s16, 3 }
  0x17   : > { %s2110_s21 = smov [#allocation11]   ;;  %s2111_s24 = smov [#allocation14]  }
  0x18   : > { %p2224_p3 = pnand %p1411_p0, %p381_p2  ;;  %s421_s22 = sshll.u32 %s2110_s21, 4  ;;  %s422_s22 = int_to_ptr.vmem [resolvable:$true] %s421_s22 }
  0x19   : > { %s445_s25 = sshll.u32 %s2111_s24, 4  ;;  %s1798_s27 = scalar_lea.vmem %s394_s18, 256  ;;  %s2237_s25 = int_to_ptr.vmem [resolvable:$true] %s445_s25 }
  0x1a   : > { %s2654_s20 = scalar_select %p2224_p3, 1, 0 }
  0x1b   : > { %p1644_p5 = pneg %p2224_p3  ;;  %p1799_p8 = scmp.ne.s32.totalorder %s394_s18, %s1798_s27 }
  0x1c   : > { %p1806_p11 = scmp.lt.s32.totalorder %s394_s18, %s394_s18  ;;  %p1807_p12 = scmp.lt.s32.totalorder %s1798_s27, %s1798_s27 }
  0x1d   : > { %p2233_p6 = pnand %p1644_p5, %p2629_p1 }
  0x1e   : > { %p1808_p13 = por %p1807_p12, %p1806_p11 }
  0x1f   : > { %s2655_s23 = scalar_select %p2233_p6, 1, 0 }
  0x20   : > { %p2241_p7 = pneg %p2233_p6 }
  0x22   : > { %s2656_s26 = scalar_select %p2241_p7, 1, 0 }
  0x23   : > { %p1801_p9 = pnand %p1799_p8, %p2241_p7 }
  0x25   : > { %p1802_p10 = pneg %p1801_p9 }
  0x27   : > { %p1809_p0 = pnand %p1808_p13, %p1802_p10 }
  0x29   : > { %1812 = shalt.err (!%p1809_p0)
}
  0x2a   : > { %s2619_s28 = smov 64   ;;  %s2621_s17 = smov 4  }
  0x2b   : > { %s2657_s4 = sld [smem:[#allocation30_spill]]  ;;  %s1824_s14 = scalar_lea.vmem %s422_s22, 16 }
  0x2c   : > { %p1825_p2 = scmp.ne.s32.totalorder %s422_s22, %s1824_s14  ;;  %s1831_s27 = scalar_lea.vmem %s422_s22, 32 }
  0x2d   : > { %p1832_p9 = scmp.lt.s32.totalorder %s422_s22, %s422_s22  ;;  %p1833_p10 = scmp.lt.s32.totalorder %s1831_s27, %s1824_s14 }
  0x2e   : > { %p1827_p5 = pnand %p1825_p2, %p2241_p7 }
  0x2f   : > { %p1834_p11 = por %p1833_p10, %p1832_p9 }
  0x30   : > { %p1828_p8 = pneg %p1827_p5 }
  0x31   : > { %1647 = dma.hbm_to_vmem [thread:$0]  (!%p2233_p6), %s2657_s4, 256, %s394_s18, [#allocation9], %s2619_s28, %s2619_s28, %s2621_s17  }
  0x32   : > { %p1835_p12 = pnand %p1834_p11, %p1828_p8 }
  0x34   : > { %1838 = shalt.err (!%p1835_p12)
}
  0x35   : > { %s2658_s7 = sld [smem:[#allocation32_spill]]  ;;  %s1850_s18 = scalar_lea.vmem %s2237_s25, 16 }
  0x36   : > { %p1851_p13 = scmp.ne.s32.totalorder %s2237_s25, %s1850_s18  ;;  %s1857_s14 = scalar_lea.vmem %s2237_s25, 32 }
  0x37   : > { %p1858_p5 = scmp.lt.s32.totalorder %s2237_s25, %s2237_s25  ;;  %p1859_p8 = scmp.lt.s32.totalorder %s1857_s14, %s1850_s18 }
  0x38   : > { %p1853_p0 = pnand %p1851_p13, %p2241_p7 }
  0x39   : > { %p1860_p9 = por %p1859_p8, %p1858_p5 }
  0x3a   : > { %p1854_p2 = pneg %p1853_p0 }
  0x3b   : > { %1653 = dma.hbm_to_vmem [thread:$0]  (!%p2233_p6), %s2658_s7, 16, %s422_s22, [#allocation12]  }
  0x3c   : > { %p1861_p10 = pnand %p1860_p9, %p1854_p2 }
  0x3e   : > { %1864 = shalt.err (!%p1861_p10)
}
  0x3f   : > { %s2659_s9 = sld [smem:[#allocation33_spill]]  ;;  %s1410_s22 = sadd.s32 4294967294, %s2107_s16  }
  0x40   : > { %s2277_s21 = sadd.s32 1, %s2107_s16   ;;  %s69_s24 = sadd.s32 1, %s2103_s15 }
  0x41   : > { %2660 = sst [smem:[#allocation26_spill]] %s2277_s21  ;;  %s66_s27 = ssub.s32 %s2107_s16, %s2277_s21 }
  0x42   : > { %p76_p11 = scmp.ne.s32.totalorder %s2103_s15, %s2099_s30  ;;  %p67_p12 = scmp.eq.s32.totalorder %s66_s27, 0 }
  0x43   : > { %p77_p13 = scmp.eq.s32.totalorder %s2107_s16, 0  ;;  %p82_p0 = scmp.ne.s32.totalorder %s2099_s30, %s2095_s29 }
  0x44   : > { %p368_p2 = scmp.eq.s32.totalorder %s2219_s19, 1  ;;  %p374_p10 = scmp.eq.s32.totalorder %s1410_s22, 1 }
  0x45   : > { %1659 = dma.hbm_to_vmem [thread:$0]  (!%p2233_p6), %s2659_s9, 16, %s2237_s25, [#allocation15]  }
  0x46   : > { %s2289_s18 = scalar_select %p67_p12, %s2103_s15, %s69_s24  }
  0x47   : > { %p78_p5 = por %p77_p13, %p76_p11  ;;  %p2293_p8 = por %p2629_p1, %p82_p0 }
  0x48   : > { %2661 = sst [smem:[#allocation27_spill]] %s2289_s18  ;;  %p2297_p9 = por %p368_p2, %p76_p11 }
  0x49   : > { %s2662_s25 = scalar_select %p2293_p8, 1, 0 }
  0x4a   : > { %s2663_s14 = scalar_select %p2297_p9, 1, 0 }
  0x4b   : > { %p1683_p4 = scmp.lt.s32.totalorder %s2107_s16, 2  ;;  %s2623_s11 = sand.u32 1, %s2103_s15  }
  0x4c   : > { %2664 = sst [smem:[#allocation28_spill]] %s2663_s14  ;;  %p2303_p3 = por %p374_p10, %p82_p0 }
  0x4d   : > { %s2309_s24 = sshll.u32 %s2623_s11, 3  ;;  %s2312_s27 = sshll.u32 %s2107_s16, 7 }
  0x4e   : > { %s2665_s13 = scalar_select %p2303_p3, 1, 0 }
  0x4f   : > { %p2314_p12 = pnand %p1683_p4, %p78_p5  ;;  %s503_s17 = sand.u32 1, %s2107_s16  }
  0x50   : > { %2666 = sst [smem:[#allocation29_spill]] %s2665_s13  ;;  %s2323_s7 = scalar_lea.hbm %s2604_s2, %s2312_s27 }
  0x51   : > { %s2667_s28 = scalar_select %p2314_p12, 1, 0 }
  0x52   : > { %s507_s11 = scalar_lea.vmem [#allocation5], %s2309_s24  ;;  %s2326_s18 = scalar_lea.sflag [#allocation6], %s503_s17 }
  0x53   : > { %s514_s9 = sshll.u32 %s507_s11, 4  ;;  %s1865_s21 = scalar_lea.hbm %s2323_s7, 128  ;;  %s515_s9 = int_to_ptr.vmem [resolvable:$true] %s514_s9 }
  0x54   : > { %p1866_p4 = scmp.ne.s32.totalorder %s2323_s7, %s1865_s21  ;;  %p2332_p11 = pneg %p2314_p12 }
  0x55   : > { %s1870_s16 = scalar_lea.hbm %s2604_s2, 256  ;;  %p1871_p2 = scmp.lt.s32.totalorder %s2323_s7, %s2604_s2 }
  0x56   : > { %s2668_s13 = scalar_select %p2332_p11, 1, 0 }
  0x57   : > { %p1868_p13 = pnand %p2332_p11, %p1866_p4  ;;  %p1872_p5 = scmp.lt.s32.totalorder %s1870_s16, %s1865_s21 }
  0x59   : > { %p1869_p0 = pneg %p1868_p13  ;;  %p1873_p10 = por %p1872_p5, %p1871_p2 }
  0x5b   : > { %p1874_p1 = pnand %p1873_p10, %p1869_p0 }
  0x5d   : > { %1877 = shalt.err (!%p1874_p1)
}
  0x5e   : > { %s1878_s17 = scalar_lea.vmem %s515_s9, 128  ;;  %s2114_s14 = smov [#allocation5]  }
  0x5f   : > { %p1879_p3 = scmp.ne.s32.totalorder %s515_s9, %s1878_s17  ;;  %s1883_s12 = sshll.u32 %s2114_s14, 4  ;;  %s1884_s12 = int_to_ptr.vmem [resolvable:$false] %s1883_s12 }
  0x60   : > { %s1885_s6 = scalar_lea.vmem %s1884_s12, 256  ;;  %p1886_p4 = scmp.lt.s32.totalorder %s515_s9, %s1884_s12 }
  0x61   : > { %p1881_p9 = pnand %p1879_p3, %p2332_p11  ;;  %p1887_p13 = scmp.lt.s32.totalorder %s1885_s6, %s1878_s17 }
  0x63   : > { %p1882_p8 = pneg %p1881_p9  ;;  %p1888_p6 = por %p1887_p13, %p1886_p4 }
  0x65   : > { %p1889_p7 = pnand %p1888_p6, %p1882_p8 }
  0x67   : > { %1892 = shalt.err (!%p1889_p7)
}
  0x68   : > { %1669 = dma.hbm_to_vmem [thread:$0]  (!%p2314_p12), %s2323_s7, 128, %s515_s9, %s2326_s18  }
  0x69   : > { %s2115_s29 = smov [#allocation10]   ;;  %s2116_s21 = smov [#allocation13]  }
  0x6a   : > { %s407_s16 = sshll.u32 %s2115_s29, 4  ;;  %s431_s4 = sshll.u32 %s2116_s21, 4  ;;  %s408_s16 = int_to_ptr.vmem [resolvable:$true] %s407_s16  ;;  %s432_s4 = int_to_ptr.vmem [resolvable:$true] %s431_s4 }
  0x6b   : > { %s1904_s22 = scalar_lea.vmem %s408_s16, 16  ;;  %p2669_p3 = scmp.ne.s32.totalorder %s2656_s26, 0 }
  0x6c   : > { %p1905_p1 = scmp.ne.s32.totalorder %s408_s16, %s1904_s22  ;;  %s1911_s6 = scalar_lea.vmem %s408_s16, 32 }
  0x6d   : > { %p1912_p2 = scmp.lt.s32.totalorder %s408_s16, %s408_s16  ;;  %p1913_p6 = scmp.lt.s32.totalorder %s1911_s6, %s1904_s22 }
  0x6e   : > { %p1907_p9 = pnand %p1905_p1, %p2669_p3 }
  0x6f   : > { %p1914_p7 = por %p1913_p6, %p1912_p2 }
  0x70   : > { %p1908_p0 = pneg %p1907_p9 }
  0x72   : > { %p1915_p8 = pnand %p1914_p7, %p1908_p0 }
  0x74   : > { %1918 = shalt.err (!%p1915_p8)
}
  0x75   : > { %p2670_p5 = scmp.ne.s32.totalorder %s2655_s23, 0  ;;  %s1930_s9 = scalar_lea.vmem %s432_s4, 1024 }
  0x76   : > { %p1931_p10 = scmp.ne.s32.totalorder %s432_s4, %s1930_s9  ;;  %p1938_p1 = scmp.lt.s32.totalorder %s432_s4, %s432_s4 }
  0x77   : > { %1650 = dma.hbm_to_vmem [thread:$0]  (!%p2670_p5), %s2607_s5, 16, %s408_s16, [#allocation9]  }
  0x78   : > { %p1933_p4 = pnand %p1931_p10, %p2669_p3  ;;  %p1939_p9 = scmp.lt.s32.totalorder %s1930_s9, %s1930_s9 }
  0x7a   : > { %p1934_p13 = pneg %p1933_p4  ;;  %p1940_p12 = por %p1939_p9, %p1938_p1 }
  0x7c   : > { %p1941_p11 = pnand %p1940_p12, %p1934_p13 }
  0x7e   : > { %1944 = shalt.err (!%p1941_p11)
}
  0x7f   : > { %s2671_s14 = smov 4   ;;  %s2672_s11 = smov 64  }
  0x80   : > { %1656 = dma.hbm_to_vmem [thread:$0]  (!%p2670_p5), %s2610_s8, 1024, %s432_s4, [#allocation12], %s2672_s11, %s2672_s11, %s2671_s14  }
  0x81   : > { %s2117_s16 = smov [#allocation16]  }
  0x82   : > { %s455_s21 = sshll.u32 %s2117_s16, 4  ;;  %s456_s21 = int_to_ptr.vmem [resolvable:$true] %s455_s21 }
  0x83   : > { %s1956_s22 = scalar_lea.vmem %s456_s21, 1024  ;;  %p1964_p12 = scmp.lt.s32.totalorder %s456_s21, %s456_s21 }
  0x84   : > { %p1957_p0 = scmp.ne.s32.totalorder %s456_s21, %s1956_s22  ;;  %p1965_p11 = scmp.lt.s32.totalorder %s1956_s22, %s1956_s22 }
  0x86   : > { %p1959_p2 = pnand %p1957_p0, %p2669_p3  ;;  %p1966_p7 = por %p1965_p11, %p1964_p12 }
  0x88   : > { %p1960_p6 = pneg %p1959_p2 }
  0x8a   : > { %p1967_p8 = pnand %p1966_p7, %p1960_p6 }
  0x8c   : > { %1970 = shalt.err (!%p1967_p8)
}
  0x8d   : > { %1662 = dma.hbm_to_vmem [thread:$0]  (!%p2670_p5), %s2612_s10, 1024, %s456_s21, [#allocation15], %s2672_s11, %s2672_s11, %s2671_s14  }
  0x8e   : > { %s2382_s7 = scalar_lea.hbm %s2603_s1, %s2312_s27  ;;  %s489_s23 = scalar_lea.vmem [#allocation2], %s2309_s24 }
  0x8f   : > { %s496_s9 = sshll.u32 %s489_s23, 4  ;;  %s2673_s17 = sand.u32 1, %s2103_s15   ;;  %s497_s9 = int_to_ptr.vmem [resolvable:$true] %s496_s9 }
  0x90   : > { %s486_s29 = scalar_lea.sflag [#allocation3], %s2673_s17  ;;  %s1971_s16 = scalar_lea.hbm %s2382_s7, 128 }
  0x91   : > { %p1972_p3 = scmp.ne.s32.totalorder %s2382_s7, %s1971_s16  ;;  %p2674_p10 = scmp.ne.s32.totalorder %s2668_s13, 0 }
  0x92   : > { %s1976_s11 = scalar_lea.hbm %s2603_s1, 256  ;;  %p1977_p5 = scmp.lt.s32.totalorder %s2382_s7, %s2603_s1 }
  0x93   : > { %p1974_p4 = pnand %p1972_p3, %p2674_p10  ;;  %p1978_p1 = scmp.lt.s32.totalorder %s1976_s11, %s1971_s16 }
  0x95   : > { %p1975_p13 = pneg %p1974_p4  ;;  %p1979_p9 = por %p1978_p1, %p1977_p5 }
  0x97   : > { %p1980_p0 = pnand %p1979_p9, %p1975_p13 }
  0x99   : > { %1983 = shalt.err (!%p1980_p0)
}
  0x9a   : > { %s1984_s4 = scalar_lea.vmem %s497_s9, 128  ;;  %s2118_s26 = smov [#allocation2]  }
  0x9b   : > { %p1985_p2 = scmp.ne.s32.totalorder %s497_s9, %s1984_s4  ;;  %s1989_s12 = sshll.u32 %s2118_s26, 4  ;;  %s1990_s12 = int_to_ptr.vmem [resolvable:$false] %s1989_s12 }
  0x9c   : > { %s1991_s23 = scalar_lea.vmem %s1990_s12, 256  ;;  %p1992_p11 = scmp.lt.s32.totalorder %s497_s9, %s1990_s12 }
  0x9d   : > { %p1987_p6 = pnand %p1985_p2, %p2674_p10  ;;  %p1993_p7 = scmp.lt.s32.totalorder %s1991_s23, %s1984_s4 }
  0x9f   : > { %p1988_p12 = pneg %p1987_p6  ;;  %p1994_p8 = por %p1993_p7, %p1992_p11 }
  0xa1   : > { %p1995_p3 = pnand %p1994_p8, %p1988_p12 }
  0xa3   : > { %1998 = shalt.err (!%p1995_p3)
}
  0xa4   : > { %p2675_p4 = scmp.ne.s32.totalorder %s2667_s28, 0  ;;  %s530_s22 = scalar_lea.hbm %s2605_s3, %s2312_s27 }
  0xa5   : > { %s525_s14 = scalar_lea.vmem [#allocation7], %s2309_s24  ;;  %s1999_s21 = scalar_lea.hbm %s530_s22, 128 }
  0xa6   : > { %1666 = dma.hbm_to_vmem [thread:$0]  (!%p2675_p4), %s2382_s7, 128, %s497_s9, %s486_s29  }
  0xa7   : > { %s532_s11 = sshll.u32 %s525_s14, 4  ;;  %p2000_p13 = scmp.ne.s32.totalorder %s530_s22, %s1999_s21  ;;  %s533_s11 = int_to_ptr.vmem [resolvable:$true] %s532_s11 }
  0xa8   : > { %s2004_s26 = scalar_lea.hbm %s2605_s3, 256  ;;  %p2005_p9 = scmp.lt.s32.totalorder %s530_s22, %s2605_s3 }
  0xa9   : > { %p2002_p5 = pnand %p2000_p13, %p2674_p10  ;;  %p2006_p0 = scmp.lt.s32.totalorder %s2004_s26, %s1999_s21 }
  0xab   : > { %p2003_p1 = pneg %p2002_p5  ;;  %p2007_p2 = por %p2006_p0, %p2005_p9 }
  0xad   : > { %p2008_p6 = pnand %p2007_p2, %p2003_p1 }
  0xaf   : > { %2011 = shalt.err (!%p2008_p6)
}
  0xb0   : > { %s2012_s24 = scalar_lea.vmem %s533_s11, 128  ;;  %s2119_s27 = smov [#allocation7]  }
  0xb1   : > { %p2013_p12 = scmp.ne.s32.totalorder %s533_s11, %s2012_s24  ;;  %s2017_s7 = sshll.u32 %s2119_s27, 4  ;;  %s2018_s7 = int_to_ptr.vmem [resolvable:$false] %s2017_s7 }
  0xb2   : > { %s2019_s9 = scalar_lea.vmem %s2018_s7, 256  ;;  %p2020_p8 = scmp.lt.s32.totalorder %s533_s11, %s2018_s7 }
  0xb3   : > { %p2015_p11 = pnand %p2013_p12, %p2674_p10  ;;  %p2021_p3 = scmp.lt.s32.totalorder %s2019_s9, %s2012_s24 }
  0xb5   : > { %p2016_p7 = pneg %p2015_p11  ;;  %p2022_p13 = por %p2021_p3, %p2020_p8 }
  0xb7   : > { %p2023_p5 = pnand %p2022_p13, %p2016_p7 }
  0xb9   : > { %2026 = shalt.err (!%p2023_p5)
}
  0xba   : > { %1672 = dma.hbm_to_vmem [thread:$0]  (!%p2675_p4), %s530_s22, 128, %s533_s11, %s2326_s18  }
  0xbb   : > { %p2676_p1 = scmp.ne.s32.totalorder %s2654_s20, 0 }
  0xbc   : > { %s2424_s13 = sand.u32 (!%p2676_p1), 1, %s2099_s30   ;;  %p2677_p10 = scmp.ne.s32.totalorder (!%p2676_p1), %s2662_s25, 0 }
  0xbd   : > { %541 = sbr.rel (%p2676_p1) target bundleno = 1659 (0x67b), region = 76  ;;  %s2427_s29 = sshll.u32 (!%p2676_p1), %s2424_s13, 3 }
  0xbe   : > { %s544_s17 = scalar_lea.sflag (!%p2676_p1), [#allocation3], %s2424_s13  ;;  %s547_s16 = scalar_lea.vmem (!%p2676_p1), [#allocation2], %s2427_s29 }
  0xc2   : > { %2070 = dma.done.wait (%p2677_p10), %s544_s17, 128  }
  0xc3   : > { %2072 = vsyncadd (%p2677_p10), %s544_s17, 4294967168  ;;  %s552_s20 = sand.u32 1, %s2219_s19   ;;  %s556_s18 = scalar_lea.vmem [#allocation5], %s2427_s29 }
  0xc4   : > { %s553_s28 = scalar_lea.sflag [#allocation6], %s552_s20 }
  0xc5   : > { %2074 = dma.done.wait (%p2677_p10), %s553_s28, 256  }
  0xc6   : > { %2076 = vsyncadd (%p2677_p10), %s553_s28, 4294967040  ;;  %s565_s22 = scalar_lea.vmem [#allocation7], %s2427_s29  ;;  %p2678_p4 = scmp.eq.s32.totalorder %s2219_s19, 0 }
  0xc8   : > { %2078 = dma.done.wait (%p2678_p4), [#allocation9], 272   ;;  %p2679_p9 = pmov %p2678_p4 }
  0xc9   : > { %p2680_p0 = pmov %p2678_p4 }
  0xca   : > { %2080 = vsyncadd (%p2679_p9), [#allocation9], 4294967024 }
  0xcb   : > { %2082 = dma.done.wait (%p2680_p0), [#allocation12], 1040   ;;  %p2681_p2 = pmov %p2680_p0 }
  0xcc   : > { %p2682_p6 = pmov %p2680_p0 }
  0xcd   : > { %2084 = vsyncadd (%p2681_p2), [#allocation12], 4294966256 }
  0xce   : > { %2086 = dma.done.wait (%p2682_p6), [#allocation15], 1040   ;;  %p2683_p12 = pmov %p2680_p0 }
  0xcf   : > { %p648_p11 = scmp.lt.s32.totalorder %s2219_s19, 1  ;;  %v2120_v0 = vmov 0.0   ;;  %vm2121_vm0 = vmmov 0   ;;  %v1733_v1 = vld [vmem:[#allocation8 + $0x8] sm:$0xff]   ;;  %v1734_v2 = vld [vmem:[#allocation8] sm:$0xff]   ;;  %vm678_vm1 = vcmask 261120  }
  0xd0   : > { %2088 = vsyncadd (%p2683_p12), [#allocation15], 4294966256  ;;  %1524 = vmatprep.subr.bf16.mxu0 %v2120_v0  ;;  %1528 = vmatprep.mubr.msk.bf16.mxu0 %vm2121_vm0, %v2120_v0  ;;  %s2684_s12 = sld [smem:[#allocation31_spill]]  ;;  %v1437_v13 = vld [vmem:[#allocation10] ss:$0 sm:$0xff]  ;;  %v1744_v25 = vld [vmem:[#allocation13 + $0x30] sm:$0xff]  }
  0xd1   : > { %s649_s25 = scalar_select %p648_p11, %s2219_s19, 1  ;;  %1532 = vmatprep.subr.bf16.mxu1 %v2120_v0  ;;  %1548 = vmatprep.mubr.msk.bf16.mxu1 %vm2121_vm0, %v2120_v0  ;;  %v1743_v24 = vld [vmem:[#allocation13 + $0x38] sm:$0xff]   ;;  %v1745_v26 = vld [vmem:[#allocation13 + $0x28] sm:$0xff]   ;;  %v1746_v27 = vld [vmem:[#allocation13 + $0x20] sm:$0xff]   ;;  %vm1200_vm2 = vcmask 130048  }
  0xd2   : > { %1525 = vmatpush3.bf16.msra.mxu0 %v1733_v1  ;;  %v1747_v28 = vld [vmem:[#allocation13 + $0x18] sm:$0xff]   ;;  %v1748_v29 = vld [vmem:[#allocation13 + $0x10] sm:$0xff]   ;;  %v1749_v30 = vld [vmem:[#allocation13 + $0x8] sm:$0xff]   ;;  %s2685_s23 = sld [smem:[#allocation35_spill]]  ;;  %s1482_s9 = sshll.u32 %s2219_s19, 7 }
  0xd3   : > { %s1436_s14 = sshll.u32 %s649_s25, 3  ;;  %1526 = vmatprep.subr.bf16.mxu0 %v2120_v0  ;;  %v1750_v31 = vld [vmem:[#allocation13] sm:$0xff]   ;;  %v1442_v32 = vld [vmem:[#allocation11] ss:$0 sm:$0xff]  ;;  %v1752_v46 = vld [vmem:[#allocation16 + $0x30] sm:$0xff]   ;;  %s2687_s7 = sld [smem:[#allocation36_spill]] }
  0xd4   : > { %s651_s6 = scalar_lea.vmem %s2602_s0, %s1436_s14  ;;  %v840_v34 = vld [vmem:[%s547_s16] sm:$0xff]  ;;  %v1756_v50 = vld [vmem:[#allocation16 + $0x10] sm:$0xff]   ;;  %s647_s17 = scalar_lea.vmem [#allocation17], %s2427_s29 }
  0xd5   : > { %v653_v3 = vld [vmem:[%s651_s6] sm:$0xff]  ;;  %v1753_v47 = vld [vmem:[#allocation16 + $0x28] sm:$0xff]   ;;  %s1228_s20 = sshll.u32 %s647_s17, 4  ;;  %s2689_s14 = sld [smem:[#allocation37_spill]]  ;;  %s1229_s20 = int_to_ptr.vmem [resolvable:$true] %s1228_s20 }
  0xd6   : > { %v654_v4 = vpack.c.bf16 %v653_v3, %v653_v3  ;;  %1527 = vmatpush3.bf16.msra.mxu0 %v1734_v2  ;;  %v1735_v5 = vld [vmem:[%s2684_s12 + $0x38] sm:$0xff]   ;;  %v1736_v6 = vld [vmem:[%s2684_s12 + $0x30] sm:$0xff]   ;;  %v1737_v7 = vld [vmem:[%s2684_s12 + $0x28] sm:$0xff]   ;;  %s1215_s21 = scalar_lea.sflag [#allocation4], %s2424_s13  ;;  %s2027_s6 = scalar_lea.vmem %s1229_s20, 128 }
  0xd7   : > { %1552 = vmatprep.subr.bf16.mxu0 %v2120_v0  ;;  %1533 = vmatpush3.bf16.msra.mxu1 %v1735_v5  ;;  %v1738_v8 = vld [vmem:[%s2684_s12 + $0x20] sm:$0xff]   ;;  %v1739_v9 = vld [vmem:[%s2684_s12 + $0x18] sm:$0xff]   ;;  %v1740_v10 = vld [vmem:[%s2684_s12 + $0x10] sm:$0xff]   ;;  %p2028_p7 = scmp.ne.s32.totalorder %s1229_s20, %s2027_s6  ;;  %s2122_s4 = smov [#allocation17]  }
  0xd8   : > { %1534 = vmatprep.subr.bf16.mxu1 %v2120_v0  ;;  %v1741_v11 = vld [vmem:[%s2684_s12 + $0x8] sm:$0xff]   ;;  %v1742_v12 = vld [vmem:[%s2684_s12] sm:$0xff]   ;;  %v960_v55 = vld [vmem:[%s556_s18] sm:$0xff]  ;;  %s2686_s18 = sld [smem:[#allocation34_spill]]  ;;  %s2031_s16 = sshll.u32 %s2122_s4, 4  ;;  %s2032_s16 = int_to_ptr.vmem [resolvable:$false] %s2031_s16 }
  0xd9   : > { %1529 = vmatmul.mubr.msk.bf16.vlgmr.msra.gmra.mxu0 %vm678_vm1, %v654_v4  ;;  %v1751_v45 = vld [vmem:[#allocation16 + $0x38] sm:$0xff]   ;;  %v1754_v48 = vld [vmem:[#allocation16 + $0x20] sm:$0xff]   ;;  %v1757_v51 = vld [vmem:[#allocation16 + $0x8] sm:$0xff]   ;;  %s2033_s19 = scalar_lea.vmem %s2032_s16, 256  ;;  %p2034_p5 = scmp.lt.s32.totalorder %s1229_s20, %s2032_s16 }
  0xda   : > { %1568 = vmatprep.mubr.msk.bf16.mxu0 %vm2121_vm0, %v2120_v0  ;;  %1553 = vmatpush3.bf16.msra.mxu0 %v1743_v24  ;;  %v1755_v49 = vld [vmem:[#allocation16 + $0x18] sm:$0xff]   ;;  %v1758_v52 = vld [vmem:[#allocation16] sm:$0xff]   ;;  %v1760_v4 = vld [vmem:[%s2685_s23 + $0x30] sm:$0xff]   ;;  %p2035_p1 = scmp.lt.s32.totalorder %s2033_s19, %s2027_s6 }
  0xdb   : > { %1535 = vmatpush3.bf16.msra.mxu1 %v1736_v6  ;;  %1554 = vmatprep.subr.bf16.mxu0 %v2120_v0  ;;  %v1452_v53 = vld [vmem:[#allocation14] ss:$0 sm:$0xff]  ;;  %v1759_v3 = vld [vmem:[%s2685_s23 + $0x38] sm:$0xff]   ;;  %v1761_v5 = vld [vmem:[%s2685_s23 + $0x28] sm:$0xff]   ;;  %s1226_s11 = scalar_lea.hbm %s2689_s14, %s1482_s9 }
  0xdc   : > { %1536 = vmatprep.subr.bf16.mxu1 %v2120_v0  ;;  %v1762_v6 = vld [vmem:[%s2685_s23 + $0x20] sm:$0xff]   ;;  %p2036_p10 = por %p2035_p1, %p2034_p5 }
  0xde   : > { %1555 = vmatpush3.bf16.msra.mxu0 %v1744_v25 }
  0xdf   : > { %1537 = vmatpush3.bf16.msra.mxu1 %v1737_v7  ;;  %1556 = vmatprep.subr.bf16.mxu0 %v2120_v0  ;;  %v1763_v7 = vld [vmem:[%s2685_s23 + $0x18] sm:$0xff]  }
  0xe0   : > { %1538 = vmatprep.subr.bf16.mxu1 %v2120_v0 }
  0xe2   : > { %1557 = vmatpush3.bf16.msra.mxu0 %v1745_v26 }
  0xe3   : > { %1539 = vmatpush3.bf16.msra.mxu1 %v1738_v8  ;;  %1558 = vmatprep.subr.bf16.mxu0 %v2120_v0  ;;  %v1764_v8 = vld [vmem:[%s2685_s23 + $0x10] sm:$0xff]  }
  0xe4   : > { %1540 = vmatprep.subr.bf16.mxu1 %v2120_v0 }
  0xe6   : > { %1559 = vmatpush3.bf16.msra.mxu0 %v1746_v27 }
  0xe7   : > { %1541 = vmatpush3.bf16.msra.mxu1 %v1739_v9  ;;  %1560 = vmatprep.subr.bf16.mxu0 %v2120_v0  ;;  %v1765_v9 = vld [vmem:[%s2685_s23 + $0x8] sm:$0xff]  }
  0xe8   : > { %1542 = vmatprep.subr.bf16.mxu1 %v2120_v0 }
  0xea   : > { %1561 = vmatpush3.bf16.msra.mxu0 %v1747_v28 }
  0xeb   : > { %1543 = vmatpush3.bf16.msra.mxu1 %v1740_v10  ;;  %1562 = vmatprep.subr.bf16.mxu0 %v2120_v0  ;;  %v1766_v10 = vld [vmem:[%s2685_s23] sm:$0xff]  }
  0xec   : > { %1544 = vmatprep.subr.bf16.mxu1 %v2120_v0 }
  0xee   : > { %1563 = vmatpush3.bf16.msra.mxu0 %v1748_v29 }
  0xef   : > { %1545 = vmatpush3.bf16.msra.mxu1 %v1741_v11  ;;  %1564 = vmatprep.subr.bf16.mxu0 %v2120_v0  ;;  %v1462_v11 = vld [vmem:[%s2686_s18] ss:$0 sm:$0xff] }
  0xf0   : > { %1546 = vmatprep.subr.bf16.mxu1 %v2120_v0 }
  0xf2   : > { %1565 = vmatpush3.bf16.msra.mxu0 %v1749_v30 }
  0xf3   : > { %1547 = vmatpush3.bf16.msra.mxu1 %v1742_v12  ;;  %1566 = vmatprep.subr.bf16.mxu0 %v2120_v0 }
  0xf4   : > { %1572 = vmatprep.subr.bf16.mxu1 %v2120_v0 }
  0xf6   : > { %1567 = vmatpush3.bf16.msra.mxu0 %v1750_v31 }
  0xf7   : > { %1592 = vmatprep.subr.bf16.mxu0 %v2120_v0 }
 0x199   : > { %v716_v14 = vpop.f32.mrf.mxu0 }
 0x19a   : > { %v717_v15 = vadd.f32 %v1437_v13, %v716_v14  ;;  %v1080_v13 = vld [vmem:[%s565_s22] sm:$0xff]  ;;  %s2688_s22 = sld [smem:[#allocation28_spill]] }
 0x19b   : > { %v1530_v16 = vpop.f32.mrf.mxu0 }
 0x19c   : > { %v1441_v17 = vmul.f32 -1.442695, %v717_v15 }
 0x19d   : > { %v719_v18 = vpop.f32.mrf.mxu0 }
 0x19e   : > { %1767 = vpow2.f32 %v1441_v17 }
 0x19f   : > { %v1531_v19 = vpop.f32.mrf.mxu0 }
 0x1a0   : > { %p2690_p8 = scmp.ne.s32.totalorder %s2688_s22, 0 }
 0x1a2   : > { %p2029_p3 = pnand %p2028_p7, %p2690_p8 }
 0x1a4   : > { %p2030_p13 = pneg %p2029_p3 }
 0x1a6   : > { %p2037_p4 = pnand %p2036_p10, %p2030_p13 }
 0x1ab   : > { %v1768_v20 = vpop.eup %1767 }
 0x1ac   : > { %v725_v21 = vadd.f32 1.0, %v1768_v20 }
 0x1ae   : > { %1769 = vrcp.f32 %v725_v21 }
 0x1bb   : > { %v1770_v22 = vpop.eup %1769 }
 0x1bc   : > { %v728_v23 = vpack.c.bf16 %v1770_v22, %v1770_v22 }
 0x1be   : > { %1549 = vmatmul.mubr.bf16.vlgmr.msra.gmra.mxu1 %v728_v23  ;;  %v1472_v23 = vld [vmem:[%s2687_s7] ss:$0 sm:$0xff] }
 0x1bf   : > { %1588 = vmatprep.mubr.msk.bf16.mxu1 %vm2121_vm0, %v2120_v0  ;;  %1573 = vmatpush3.bf16.msra.mxu1 %v1751_v45 }
 0x1c0   : > { %1574 = vmatprep.subr.bf16.mxu1 %v2120_v0 }
 0x1c3   : > { %1575 = vmatpush3.bf16.msra.mxu1 %v1752_v46 }
 0x1c4   : > { %1576 = vmatprep.subr.bf16.mxu1 %v2120_v0 }
 0x1c7   : > { %1577 = vmatpush3.bf16.msra.mxu1 %v1753_v47 }
 0x1c8   : > { %1578 = vmatprep.subr.bf16.mxu1 %v2120_v0 }
 0x1cb   : > { %1579 = vmatpush3.bf16.msra.mxu1 %v1754_v48 }
 0x1cc   : > { %1580 = vmatprep.subr.bf16.mxu1 %v2120_v0 }
 0x1cf   : > { %1581 = vmatpush3.bf16.msra.mxu1 %v1755_v49 }
 0x1d0   : > { %1582 = vmatprep.subr.bf16.mxu1 %v2120_v0 }
 0x1d3   : > { %1583 = vmatpush3.bf16.msra.mxu1 %v1756_v50 }
 0x1d4   : > { %1584 = vmatprep.subr.bf16.mxu1 %v2120_v0 }
 0x1d7   : > { %1585 = vmatpush3.bf16.msra.mxu1 %v1757_v51 }
 0x1d8   : > { %1586 = vmatprep.subr.bf16.mxu1 %v2120_v0 }
 0x1db   : > { %1587 = vmatpush3.bf16.msra.mxu1 %v1758_v52 }
 0x27e   : > { %v834_v33 = vpop.f32.mrf.mxu1 }
 0x27f   : > { %v835_v35 = vadd.f32 %v1442_v32, %v834_v33 }
 0x280   : > { %v1550_v36 = vpop.f32.mrf.mxu1 }
 0x281   : > { %v841_v37 = vmul.f32 %v840_v34, %v835_v35 }
 0x282   : > { %v837_v38 = vpop.f32.mrf.mxu1 }
 0x283   : > { %v1451_v39 = vmul.f32 -1.442695, %v841_v37 }
 0x284   : > { %v1551_v40 = vpop.f32.mrf.mxu1 }
 0x285   : > { %1771 = vpow2.f32 %v1451_v39 }
 0x292   : > { %v1772_v41 = vpop.eup %1771 }
 0x293   : > { %v845_v42 = vadd.f32 1.0, %v1772_v41 }
 0x295   : > { %1773 = vrcp.f32 %v845_v42 }
 0x2a2   : > { %v1774_v43 = vpop.eup %1773 }
 0x2a3   : > { %v848_v44 = vpack.c.bf16 %v1774_v43, %v1774_v43 }
 0x2a5   : > { %1569 = vmatmul.mubr.bf16.vlgmr.msra.gmra.mxu0 %v848_v44 }
 0x2a6   : > { %1608 = vmatprep.mubr.msk.bf16.mxu0 %vm2121_vm0, %v2120_v0  ;;  %1593 = vmatpush3.bf16.msra.mxu0 %v1759_v3 }
 0x2a7   : > { %1594 = vmatprep.subr.bf16.mxu0 %v2120_v0 }
 0x2aa   : > { %1595 = vmatpush3.bf16.msra.mxu0 %v1760_v4 }
 0x2ab   : > { %1596 = vmatprep.subr.bf16.mxu0 %v2120_v0 }
 0x2ae   : > { %1597 = vmatpush3.bf16.msra.mxu0 %v1761_v5 }
 0x2af   : > { %1598 = vmatprep.subr.bf16.mxu0 %v2120_v0 }
 0x2b2   : > { %1599 = vmatpush3.bf16.msra.mxu0 %v1762_v6 }
 0x2b3   : > { %1600 = vmatprep.subr.bf16.mxu0 %v2120_v0 }
 0x2b6   : > { %1601 = vmatpush3.bf16.msra.mxu0 %v1763_v7 }
 0x2b7   : > { %1602 = vmatprep.subr.bf16.mxu0 %v2120_v0 }
 0x2ba   : > { %1603 = vmatpush3.bf16.msra.mxu0 %v1764_v8 }
 0x2bb   : > { %1604 = vmatprep.subr.bf16.mxu0 %v2120_v0 }
 0x2be   : > { %1605 = vmatpush3.bf16.msra.mxu0 %v1765_v9 }
 0x2bf   : > { %1606 = vmatprep.subr.bf16.mxu0 %v2120_v0 }
 0x2c2   : > { %1607 = vmatpush3.bf16.msra.mxu0 %v1766_v10 }
 0x365   : > { %v954_v54 = vpop.f32.mrf.mxu0 }
 0x366   : > { %v955_v56 = vadd.f32 %v1452_v53, %v954_v54 }
 0x367   : > { %v1570_v57 = vpop.f32.mrf.mxu0 }
 0x368   : > { %v961_v58 = vmul.f32 %v960_v55, %v955_v56 }
 0x369   : > { %v957_v59 = vpop.f32.mrf.mxu0 }
 0x36a   : > { %v1461_v60 = vmul.f32 -1.442695, %v961_v58 }
 0x36b   : > { %v1571_v61 = vpop.f32.mrf.mxu0 }
 0x36c   : > { %1775 = vpow2.f32 %v1461_v60 }
 0x379   : > { %v1776_v62 = vpop.eup %1775 }
 0x37a   : > { %v965_v63 = vadd.f32 1.0, %v1776_v62 }
 0x37c   : > { %1777 = vrcp.f32 %v965_v63 }
 0x389   : > { %v1778_v1 = vpop.eup %1777 }
 0x38a   : > { %v968_v2 = vpack.c.bf16 %v1778_v1, %v1778_v1 }
 0x38c   : > { %1589 = vmatmul.mubr.bf16.vlgmr.msra.gmra.mxu1 %v968_v2 }
 0x44c   : > { %v1074_v12 = vpop.f32.mrf.mxu1 }
 0x44d   : > { %v1075_v14 = vadd.f32 %v1462_v11, %v1074_v12 }
 0x44e   : > { %v1590_v15 = vpop.f32.mrf.mxu1 }
 0x44f   : > { %v1081_v16 = vmul.f32 %v1080_v13, %v1075_v14 }
 0x450   : > { %v1077_v17 = vpop.f32.mrf.mxu1 }
 0x451   : > { %v1471_v18 = vmul.f32 -1.442695, %v1081_v16 }
 0x452   : > { %v1591_v19 = vpop.f32.mrf.mxu1 }
 0x453   : > { %1779 = vpow2.f32 %v1471_v18 }
 0x460   : > { %v1780_v20 = vpop.eup %1779 }
 0x461   : > { %v1085_v21 = vadd.f32 1.0, %v1780_v20 }
 0x463   : > { %1781 = vrcp.f32 %v1085_v21 }
 0x470   : > { %v1782_v22 = vpop.eup %1781 }
 0x471   : > { %v1088_v0 = vpack.c.bf16 %v1782_v22, %v1782_v22 }
 0x473   : > { %1609 = vmatmul.mubr.bf16.vlgmr.msra.gmra.mxu0 %v1088_v0 }
 0x533   : > { %v1194_v24 = vpop.f32.mrf.mxu0 }
 0x534   : > { %v1195_v25 = vadd.f32 %v1472_v23, %v1194_v24 }
 0x535   : > { %v1610_v26 = vpop.f32.mrf.mxu0 }
 0x536   : > { %v1201_v27 = vsel %vm1200_vm2, %v1195_v25, -inf }
 0x537   : > { %1202 = vmax.xlane.f32.xlu0 %v1201_v27  ;;  %v1197_v28 = vpop.f32.mrf.mxu0 }
 0x539   : > { %v1611_v29 = vpop.f32.mrf.mxu0 }
 0x5c0   : > { %v1203_v30 = vpop.xlane.xlu0 %1202 }
 0x5c1   : > { %v1204_v31 = vsub.f32 %v1195_v25, %v1203_v30 }
 0x5c3   : > { %v1205_v32 = vmul.f32 1.442695, %v1204_v31 }
 0x5c5   : > { %1783 = vpow2.f32 %v1205_v32 }
 0x5d2   : > { %v1784_v33 = vpop.eup %1783 }
 0x5d3   : > { %v1207_v34 = vsel %vm1200_vm2, %v1784_v33, 0.0 }
 0x5d4   : > { %1208 = vadd.xlane.f32.xlu0 %v1207_v34 }
 0x65d   : > { %v1209_v35 = vpop.xlane.xlu0 %1208 }
 0x65e   : > { %1785 = vrcp.f32 %v1209_v35 }
 0x66b   : > { %v1786_v36 = vpop.eup %1785 }
 0x66c   : > { %v1212_v37 = vmul.f32 %v1786_v36, %v1784_v33 }
 0x66e   : > { %1213 = vst.msk [vmem:[%s647_s17] sm:$0xff] %vm1200_vm2, %v1212_v37 }
 0x66f   : > { %2040 = shalt.err (!%p2037_p4)
}
 0x670   : > { %s2041_s29 = scalar_lea.hbm %s1226_s11, 128  ;;  %s2045_s18 = scalar_lea.hbm %s2689_s14, 256 }
 0x671   : > { %p2042_p9 = scmp.ne.s32.totalorder %s1226_s11, %s2041_s29  ;;  %p2046_p6 = scmp.lt.s32.totalorder %s1226_s11, %s2689_s14 }
 0x672   : > { %p2047_p12 = scmp.lt.s32.totalorder %s2045_s18, %s2041_s29 }
 0x673   : > { %p2043_p0 = pnand %p2042_p9, %p2690_p8 }
 0x674   : > { %p2048_p11 = por %p2047_p12, %p2046_p6 }
 0x675   : > { %p2044_p2 = pneg %p2043_p0 }
 0x677   : > { %p2049_p7 = pnand %p2048_p11, %p2044_p2 }
 0x679   : > { %2052 = shalt.err (!%p2049_p7)
}
 0x67a   : > { %1642 = dma.vmem_to_hbm [thread:$0]  (%p2690_p8), %s1229_s20, 128, %s1226_s11, %s1215_s21  }
 0x67b PF: > { %s2691_s7 = sld [smem:[#allocation24_spill]] }
 0x67c   : > { %s2692_s9 = sld [smem:[#allocation29_spill]] }
 0x67d   : > { %s2693_s17 = sld [smem:[#allocation25_spill]] }
 0x681   : > { %s1240_s28 = sand.u32 1, %s2691_s7  }
 0x682   : > { %p2694_p3 = scmp.ne.s32.totalorder %s2692_s9, 0  ;;  %s1241_s25 = scalar_lea.sflag [#allocation4], %s1240_s28 }
 0x683   : > { %p2695_p13 = scmp.ge.s32.totalorder %s2693_s17, 2 }
 0x685   : > { %p1674_p5 = pnand %p2695_p13, %p2694_p3 }
 0x687   : > { %p1675_p1 = pneg %p1674_p5 }
 0x689   : > { %2090 = dma.done.wait (%p1675_p1), %s1241_s25, 128  }
 0x68a   : > { %2092 = vsyncadd (%p1675_p1), %s1241_s25, 4294967168  ;;  %s2696_s16 = sld [smem:[#allocation26_spill]]  ;;  %s2698_s29 = smov %s2099_s30 }
 0x68b   : > { %s2697_s6 = sld [smem:[#allocation27_spill]]  ;;  %s2699_s30 = smov %s2103_s15 }
 0x690   : > { %p33_p10 = scmp.ge.s32.totalorder %s2696_s16, 4  }
 0x691   : > { %s2700_s15 = smov %s2697_s6 }
 0x692   :  { %35 = sbr.rel (!%p33_p10) target bundleno = 19 (0x13), region = 172 }
 0x697   :  { %1246 = vsyncpa [#allocation3], 1 }
 0x698   :  { %1248 = vsyncpa [#allocation3 + $0x1], 1 }
 0x699   :  { %1249 = vsyncpa [#allocation6], 1 }
 0x69a   :  { %1251 = vsyncpa [#allocation6 + $0x1], 1 }
 0x69b   :  { %1252 = vsyncpa [#allocation9], 1 }
 0x69c   :  { %1253 = vsyncpa [#allocation12], 1 }
 0x69d   :  { %1254 = vsyncpa [#allocation15], 1 }
 0x69e   :  { %1255 = vsyncpa [#allocation4], 1 }
 0x69f   :  { %1257 = vsyncpa [#allocation4 + $0x1], 1 }

</bundles_post_ra>
